<compile_context>
chip_gen: v6e
topology: v6e:2x2x1
jax: 0.10.0
libtpu: 0.0.40
codegen_flags: <defaults>
</compile_context>

<pallas_src>
import functools

import jax
import jax.numpy as jnp
from jax.experimental import pallas as pl
from jax.experimental.pallas import tpu as pltpu


def _round_up(n, m):
    return (n + m - 1) // m * m


def qnet_kernel(x_ref, w1_ref, w2_ref, b_ref, out_ref, *, hidden, h_off):
    # Layer 1: bf16 matmul on the MXU with f32 accumulation.
    h = jnp.dot(x_ref[...], w1_ref[...], preferred_element_type=jnp.float32)
    # Bias + ReLU in f32 on the VPU.
    h = jnp.maximum(h + b_ref[:, :hidden], 0.0)
    # Layer 2: cast activations to bf16 for the MXU, accumulate in f32.
    o = jnp.dot(h.astype(w2_ref.dtype), w2_ref[...],
                preferred_element_type=jnp.float32)
    # Lane-dense (width-128 multiple) f32 store.
    out_ref[...] = o + b_ref[:, h_off:]


def linear_qnet_forward(x, w1, b1, w2, b2, *, tm=256):
    """Forward pass of Linear_QNet.

    x: (B, F) f32, w1: (F, H) f32, b1: (H,) f32, w2: (H, O) f32, b2: (O,) f32
    returns (B, O) f32 = relu(x @ w1 + b1) @ w2 + b2
    """
    B, F = x.shape
    H = w1.shape[1]
    O = w2.shape[1]

    # Lane-dense padded output width; offset of b2 inside the packed bias slab.
    O_pad = _round_up(max(O, 128), 128)
    H_off = _round_up(H, 128)

    # Batch tile: multiple of 8 sublanes, capped at `tm`; pad B up to a multiple.
    tm = max(8, min(tm, _round_up(B, 8)))
    B_pad = _round_up(B, tm)

    # bf16 operands for the MXU; biases stay f32 and are packed into ONE slab
    # (single small DMA instead of two).
    x_p = jnp.zeros((B_pad, F), jnp.bfloat16).at[:B, :].set(x.astype(jnp.bfloat16))
    w1_b = w1.astype(jnp.bfloat16)
    w2_b = jnp.zeros((H, O_pad), jnp.bfloat16).at[:, :O].set(w2.astype(jnp.bfloat16))
    b_slab = (jnp.zeros((1, H_off + O_pad), jnp.float32)
              .at[:, :H].set(b1.reshape(1, H))
              .at[:, H_off:H_off + O].set(b2.reshape(1, O)))

    kernel = functools.partial(qnet_kernel, hidden=H, h_off=H_off)

    out_padded = pl.pallas_call(
        kernel,
        out_shape=jax.ShapeDtypeStruct((B_pad, O_pad), jnp.float32),
        grid_spec=pltpu.PrefetchScalarGridSpec(
            num_scalar_prefetch=0,
            grid=(B_pad // tm,),
            in_specs=[
                pl.BlockSpec((tm, F), lambda i: (i, 0)),             # x: tiled over batch
                pl.BlockSpec((F, H), lambda i: (0, 0)),              # w1: resident
                pl.BlockSpec((H, O_pad), lambda i: (0, 0)),          # w2: resident (O padded)
                pl.BlockSpec((1, H_off + O_pad), lambda i: (0, 0)),  # packed biases: resident
            ],
            out_specs=pl.BlockSpec((tm, O_pad), lambda i: (i, 0)),   # lane-dense output
        ),
        compiler_params=pltpu.CompilerParams(
            dimension_semantics=("parallel",),      # both TensorCores on v7x
            vmem_limit_bytes=32 * 1024 * 1024,      # headroom on v7x's 64 MiB VMEM
        ),
    )(x_p, w1_b, w2_b, b_slab)

    return out_padded[:B, :O]


def init_params(key, input_size, hidden_size, output_size):
    """Deterministic init matching PyTorch nn.Linear default:
       U(-1/sqrt(fan_in), 1/sqrt(fan_in)) for both weight and bias.
       Weights stored pre-transposed as (in, out) so the kernel does x @ W."""
    k1, k2, k3, k4 = jax.random.split(key, 4)
    bound1 = 1.0 / jnp.sqrt(jnp.float32(input_size))
    bound2 = 1.0 / jnp.sqrt(jnp.float32(hidden_size))
    w1 = jax.random.uniform(k1, (input_size, hidden_size), jnp.float32,
                            minval=-bound1, maxval=bound1)
    b1 = jax.random.uniform(k2, (hidden_size,), jnp.float32,
                            minval=-bound1, maxval=bound1)
    w2 = jax.random.uniform(k3, (hidden_size, output_size), jnp.float32,
                            minval=-bound2, maxval=bound2)
    b2 = jax.random.uniform(k4, (output_size,), jnp.float32,
                            minval=-bound2, maxval=bound2)
    return w1, b1, w2, b2


if __name__ == "__main__":
    # Snake-style Q-net config (Linear_QNet(11, 256, 3)) with a replay-buffer
    # sized minibatch so the batch grid / pipelining is actually exercised.
    batch, input_size, hidden_size, output_size = 512, 11, 256, 3

    key = jax.random.PRNGKey(0)
    kx, kp = jax.random.split(key)
    x = jax.random.normal(kx, (batch, input_size), dtype=jnp.float32)
    w1, b1, w2, b2 = init_params(kp, input_size, hidden_size, output_size)

    out = linear_qnet_forward(x, w1, b1, w2, b2)
    out = jax.block_until_ready(out)
    assert out.shape == (batch, output_size)

    # Reference in plain JAX, mirroring the kernel's bf16-operand / f32-accum scheme.
    xb = x.astype(jnp.bfloat16).astype(jnp.float32)
    w1b = w1.astype(jnp.bfloat16).astype(jnp.float32)
    w2b = w2.astype(jnp.bfloat16).astype(jnp.float32)
    h_ref = jnp.maximum(xb @ w1b + b1, 0.0)
    ref = h_ref.astype(jnp.bfloat16).astype(jnp.float32) @ w2b + b2
    assert jnp.allclose(out, ref, atol=1e-2, rtol=1e-2), \
        float(jnp.max(jnp.abs(out - ref)))

    print("KERNEL_OK")
</pallas_src>

<mosaic_0001>
module attributes {stable_mosaic.version = 11 : i64} {
  func.func @qnet_kernel(%arg0: i32, %arg1: memref<256x11xbf16, #tpu.memory_space<vmem>>, %arg2: memref<11x256xbf16, #tpu.memory_space<vmem>>, %arg3: memref<256x128xbf16, #tpu.memory_space<vmem>>, %arg4: memref<1x384xf32, #tpu.memory_space<vmem>>, %arg5: memref<256x128xf32, #tpu.memory_space<vmem>>) attributes {dimension_semantics = [#tpu.dimension_semantics<parallel>], iteration_bounds = array<i64: 2>, scalar_prefetch = 0 : i64, scratch_operands = 0 : i64, tpu.core_type = #tpu.core_type<tc>, window_params = [{transform_indices = @transform_0, window_bounds = array<i64: 256, 11>}, {pipeline_mode = #tpu.pipeline_mode<synchronous>, transform_indices = @transform_1, window_bounds = array<i64: 11, 256>}, {pipeline_mode = #tpu.pipeline_mode<synchronous>, transform_indices = @transform_2, window_bounds = array<i64: 256, 128>}, {pipeline_mode = #tpu.pipeline_mode<synchronous>, transform_indices = @transform_3, window_bounds = array<i64: 1, 384>}, {transform_indices = @transform_4, window_bounds = array<i64: 256, 128>}]} {
    %c0 = arith.constant 0 : index
    %c0_0 = arith.constant 0 : index
    %0 = vector.load %arg1[%c0, %c0_0] : memref<256x11xbf16, #tpu.memory_space<vmem>>, vector<256x11xbf16>
    %c0_1 = arith.constant 0 : index
    %c0_2 = arith.constant 0 : index
    %1 = vector.load %arg2[%c0_1, %c0_2] : memref<11x256xbf16, #tpu.memory_space<vmem>>, vector<11x256xbf16>
    %cst = arith.constant dense<0.000000e+00> : vector<256x256xf32>
    %2 = tpu.matmul %0, %1, %cst {dimension_numbers = #tpu.dot_dimension_numbers<[1], [0], [0], [1], [0, 0, 1, 1], [], []>} : vector<256x11xbf16>, vector<11x256xbf16>, vector<256x256xf32> -> vector<256x256xf32>
    %c0_3 = arith.constant 0 : index
    %c0_4 = arith.constant 0 : index
    %3 = vector.load %arg4[%c0_3, %c0_4] : memref<1x384xf32, #tpu.memory_space<vmem>>, vector<1x256xf32>
    %4 = vector.broadcast %3 : vector<1x256xf32> to vector<256x256xf32>
    %5 = arith.addf %2, %4 : vector<256x256xf32>
    %cst_5 = arith.constant 0.000000e+00 : f32
    %6 = vector.broadcast %cst_5 : f32 to vector<256x256xf32>
    %7 = arith.maximumf %5, %6 : vector<256x256xf32>
    %8 = arith.truncf %7 : vector<256x256xf32> to vector<256x256xbf16>
    %c0_6 = arith.constant 0 : index
    %c0_7 = arith.constant 0 : index
    %9 = vector.load %arg3[%c0_6, %c0_7] : memref<256x128xbf16, #tpu.memory_space<vmem>>, vector<256x128xbf16>
    %cst_8 = arith.constant dense<0.000000e+00> : vector<256x128xf32>
    %10 = tpu.matmul %8, %9, %cst_8 {dimension_numbers = #tpu.dot_dimension_numbers<[1], [0], [0], [1], [0, 0, 1, 1], [], []>} : vector<256x256xbf16>, vector<256x128xbf16>, vector<256x128xf32> -> vector<256x128xf32>
    %c0_9 = arith.constant 0 : index
    %c256 = arith.constant 256 : index
    %11 = vector.load %arg4[%c0_9, %c256] : memref<1x384xf32, #tpu.memory_space<vmem>>, vector<1x128xf32>
    %12 = vector.broadcast %11 : vector<1x128xf32> to vector<256x128xf32>
    %13 = arith.addf %10, %12 : vector<256x128xf32>
    %c0_10 = arith.constant 0 : index
    %c0_11 = arith.constant 0 : index
    %14 = vector.load %arg5[%c0_10, %c0_11] : memref<256x128xf32, #tpu.memory_space<vmem>>, vector<256x128xf32>
    tpu.vector_store %arg5[%c0_10, %c0_11], %13 {strides = array<i32>} : memref<256x128xf32, #tpu.memory_space<vmem>>, vector<256x128xf32>,
    return
  }
  func.func @transform_0(%arg0: i32) -> (i32, i32) {
    %c0_i32 = arith.constant 0 : i32
    %c0_i32_0 = arith.constant 0 : i32
    return %arg0, %c0_i32 : i32, i32
  }
  func.func @transform_1(%arg0: i32) -> (i32, i32) {
    %c0_i32 = arith.constant 0 : i32
    %c0_i32_0 = arith.constant 0 : i32
    %c0_i32_1 = arith.constant 0 : i32
    return %c0_i32, %c0_i32_0 : i32, i32
  }
  func.func @transform_2(%arg0: i32) -> (i32, i32) {
    %c0_i32 = arith.constant 0 : i32
    %c0_i32_0 = arith.constant 0 : i32
    %c0_i32_1 = arith.constant 0 : i32
    return %c0_i32, %c0_i32_0 : i32, i32
  }
  func.func @transform_3(%arg0: i32) -> (i32, i32) {
    %c0_i32 = arith.constant 0 : i32
    %c0_i32_0 = arith.constant 0 : i32
    %c0_i32_1 = arith.constant 0 : i32
    return %c0_i32, %c0_i32_0 : i32, i32
  }
  func.func @transform_4(%arg0: i32) -> (i32, i32) {
    %c0_i32 = arith.constant 0 : i32
    %c0_i32_0 = arith.constant 0 : i32
    return %arg0, %c0_i32 : i32, i32
  }
}

</mosaic_0001>

<bundles_post_ra>
// kernel: tpu_custom_call.1
= control target key start
LH: loop header
LB: loop body
LE: loop exit
PB: predicated region body
PF: predicated region fallthrough
CT: control target
= control target key end

     0   :  { %9 = vsyncpa [#allocation3], 0  ;;  %s1800_s0 = inlined_call_operand.vmem [shape: bf16[512,11], index: 0, kind: input, shape index: {}]   ;;  %s1801_s1 = inlined_call_operand.vmem [shape: bf16[11,256], index: 1, kind: input, shape index: {}]   ;;  %s1802_s2 = inlined_call_operand.vmem [shape: bf16[256,128], index: 2, kind: input, shape index: {}]   ;;  %s1803_s3 = inlined_call_operand.vmem [shape: f32[1,384], index: 3, kind: input, shape index: {}]   ;;  %s1804_s4 = inlined_call_operand.hbm [shape: f32[512,128], index: 4, kind: output, shape index: {}]  }
   0x1   :  { %11 = vsyncpa [#allocation3 + $0x1], 0  ;;  %s1448_s15 = smov 0   ;;  %s1450_s16 = smov 0  }
   0x2   :  { %s1452_s17 = smov 0   ;;  %s1454_s18 = smov 0  }
   0x3 LB: > { %s1469_s19 = sadd.s32 4294967295, %s1416_s18   ;;  %s1086_s20 = sadd.s32 4294967294, %s1416_s18   ;;  %s1416_s18 = sphi %s1454_s18, %s1810_s18   ;;  %s1412_s17 = sphi %s1452_s17, %s1809_s17   ;;  %s1408_s16 = sphi %s1450_s16, %s1808_s16   ;;  %s1404_s15 = sphi %s1448_s15, %s1807_s15  }
   0x4   : > { %s1473_s21 = sadd.s32 1, %s1416_s18   ;;  %s113_s22 = sadd.s32 1, %s1412_s17 }
   0x5   : > { %s110_s23 = ssub.s32 %s1416_s18, %s1473_s21  ;;  %p123_p0 = scmp.ne.s32.totalorder %s1412_s17, %s1408_s16 }
   0x6   : > { %p111_p1 = scmp.eq.s32.totalorder %s110_s23, 0  ;;  %p124_p2 = scmp.eq.s32.totalorder %s1469_s19, 1 }
   0x7   : > { %p129_p3 = scmp.ne.s32.totalorder %s1408_s16, %s1404_s15  ;;  %p130_p4 = scmp.eq.s32.totalorder %s1086_s20, 1 }
   0x8   : > { %s1484_s24 = scalar_select %p111_p1, %s1412_s17, %s113_s22  }
   0x9   : > { %p1486_p5 = por %p124_p2, %p123_p0  ;;  %p1490_p6 = por %p130_p4, %p129_p3 }
   0xa   : > { %p1089_p7 = scmp.ge.s32.totalorder %s1416_s18, 1  ;;  %p166_p8 = scmp.lt.s32.totalorder %s1416_s18, 3 }
   0xc   : > { %p167_p9 = pnand %p1089_p7, %p166_p8 }
   0xd   : > { %s1091_s5 = sshll.u32 (!%p167_p9), %s1469_s19, 5  ;;  %s1149_s20 = sshll.u32 (!%p167_p9), %s1469_s19, 12 }
   0xe   : > { %170 = sbr.rel (%p167_p9) target bundleno = 571 (0x23b), region = 36  ;;  %p193_p10 = scmp.lt.s32.totalorder (!%p167_p9), %s1091_s5, 63 }
   0xf   : > { %s1752_s29 = scalar_lea.hbm (!%p167_p9), %s1804_s4, %s1149_s20 }
  0x13   : > { %v1321_v0 = vld [vmem:[%s1801_s1 + $0x4] ss:$8 sps:$4 sm:$0x3f]   ;;  %vm383_vm0 = vcmask 1044480   ;;  %vm384_vm1 = vcmask 1045504   ;;  %v1418_v2 = vmov 65535   ;;  %v236_v40 = vlaneseq }
  0x14   : > { %v1323_v1 = vld [vmem:[%s1801_s1] ss:$8 sps:$4 sm:$0x3f]   ;;  %v385_v3 = vsel %vm383_vm0, 4294967295, %v1418_v2  ;;  %v1419_v5 = vmov 0   ;;  %v1340_v6 = vld [vmem:[%s1802_s2 + $0x78] sm:$0xff]  }
  0x15   : > { %v386_v4 = vsel %vm384_vm1, %v385_v3, 0  ;;  %425 = vmatprep.mubr.bf16.mxu0 %v1419_v5  ;;  %v1341_v7 = vld [vmem:[%s1802_s2 + $0x38] sm:$0xff]   ;;  %s1812_s5 = smov (!%p193_p10, %s1091_s5), 63  ;;  %v1342_v10 = vld [vmem:[%s1802_s2 + $0x70] sm:$0xff]   ;;  %1262 = vmatprep.subr.bf16.mxu1 %v1340_v6  ;;  %vm334_vm2 = vcmask 89088   ;;  %v1344_v12 = vld [vmem:[%s1802_s2 + $0x68] sm:$0xff]  }
  0x16   : > { %v391_v8 = vand.u32 %v1321_v0, %v386_v4  ;;  %v388_v9 = vand.u32 %v1323_v1, %v386_v4  ;;  %1270 = vmatpush3.bf16.msra.mxu1 %v1341_v7  ;;  %s1092_s12 = sshll.u32 %s1812_s5, 2  ;;  %v1343_v11 = vld [vmem:[%s1802_s2 + $0x30] sm:$0xff]   ;;  %v1345_v14 = vld [vmem:[%s1802_s2 + $0x28] sm:$0xff]   ;;  %v1346_v17 = vld [vmem:[%s1802_s2 + $0x60] sm:$0xff]   ;;  %v237_v41 = vshrl.u32 %v236_v40, 7  ;;  %s1420_s5 = smov [#allocation2]  }
  0x17   : > { %1263 = vmatprep.subr.bf16.mxu1 %v1342_v10  ;;  %s1519_s23 = scalar_lea.vmem %s1800_s0, %s1092_s12  ;;  %v1347_v18 = vld [vmem:[%s1802_s2 + $0x20] sm:$0xff]   ;;  %v1348_v19 = vld [vmem:[%s1802_s2 + $0x58] sm:$0xff]   ;;  %v1350_v27 = vld [vmem:[%s1802_s2 + $0x50] sm:$0xff]   ;;  %s1360_s6 = sshll.u32 %s1420_s5, 4  ;;  %s1361_s6 = int_to_ptr.vmem [resolvable:$false] %s1360_s6 }
  0x18   : > { %407 = vmatprep.subr.bf16.mxu0 %v391_v8  ;;  %v1324_v13 = vld [vmem:[%s1519_s23] sm:$0xff]   ;;  %v1325_v15 = vld [vmem:[%s1519_s23 + $0x8] sm:$0xff]   ;;  %v1326_v16 = vld [vmem:[%s1519_s23 + $0x10] sm:$0xff]   ;;  %v242_v42 = vsub.s32 1, %v237_v41  ;;  %v238_v43 = vsub.s32 0, %v237_v41  ;;  %s1362_s7 = scalar_lea.vmem %s1361_s6, 8192 }
  0x19   : > { %408 = vmatpush1.bf16.msra.mxu0 %v388_v9  ;;  %v1349_v20 = vld [vmem:[%s1802_s2 + $0x18] sm:$0xff]   ;;  %v1328_v22 = vld [vmem:[%s1519_s23 + $0x20] sm:$0xff]   ;;  %v1329_v23 = vld [vmem:[%s1519_s23 + $0x28] sm:$0xff]  }
  0x1a   : > { %1150 = vmatprep.subr.bf16.mxu0 %v1340_v6  ;;  %1271 = vmatpush3.bf16.msra.mxu1 %v1343_v11  ;;  %v1327_v21 = vld [vmem:[%s1519_s23 + $0x18] sm:$0xff]   ;;  %v1330_v24 = vld [vmem:[%s1519_s23 + $0x30] sm:$0xff]   ;;  %v1332_v26 = vld [vmem:[%s1519_s23 + $0x40] sm:$0xff]  }
  0x1b   : > { %1264 = vmatprep.subr.bf16.mxu1 %v1344_v12  ;;  %v1331_v25 = vld [vmem:[%s1519_s23 + $0x38] sm:$0xff]   ;;  %v1351_v28 = vld [vmem:[%s1802_s2 + $0x10] sm:$0xff]   ;;  %v1333_v29 = vld [vmem:[%s1519_s23 + $0x48] sm:$0xff]  }
  0x1c   : > { %1111 = vmatmul.mubr.msk.bf16.vlgmr.msra.gmra.mxu0 %vm334_vm2, %v1324_v13  ;;  %v1352_v30 = vld [vmem:[%s1802_s2 + $0x48] sm:$0xff]   ;;  %v1354_v32 = vld [vmem:[%s1802_s2 + $0x40] sm:$0xff]   ;;  %v1334_v34 = vld [vmem:[%s1519_s23 + $0x50] sm:$0xff]  }
  0x1d   : > { %435 = vmatprep.mubr.bf16.mxu0 %v1419_v5  ;;  %1151 = vmatpush3.bf16.msra.mxu0 %v1341_v7  ;;  %v1353_v31 = vld [vmem:[%s1802_s2 + $0x8] sm:$0xff]   ;;  %v1355_v33 = vld [vmem:[%s1802_s2] sm:$0xff]   ;;  %v1335_v35 = vld [vmem:[%s1519_s23 + $0x58] sm:$0xff]  }
  0x1e   : > { %1152 = vmatprep.subr.bf16.mxu0 %v1342_v10  ;;  %1272 = vmatpush3.bf16.msra.mxu1 %v1345_v14  ;;  %v1336_v36 = vld [vmem:[%s1519_s23 + $0x60] sm:$0xff]   ;;  %v1337_v37 = vld [vmem:[%s1519_s23 + $0x68] sm:$0xff]   ;;  %v1338_v38 = vld [vmem:[%s1519_s23 + $0x70] sm:$0xff]  }
  0x1f   : > { %1265 = vmatprep.subr.bf16.mxu1 %v1346_v17  ;;  %v1339_v39 = vld [vmem:[%s1519_s23 + $0x78] sm:$0xff]   ;;  %v234_v44 = vld [vmem:[%s1803_s3] sm:$0x3]  ;;  %s189_s23 = sand.u32 1, %s1408_s16  }
  0x20   : > { %v1607_v46 = vrot.slane %v234_v44, %v242_v42  ;;  %v1609_v47 = vrot.slane %v234_v44, %v238_v43  ;;  %s1090_s11 = sshll.u32 %s189_s23, 8  ;;  %s1760_s30 = scalar_lea.sflag [#allocation3], %s189_s23 }
  0x21   : > { %1153 = vmatpush3.bf16.msra.mxu0 %v1343_v11  ;;  %s1684_s14 = scalar_lea.vmem [#allocation2], %s1090_s11 }
  0x22   : > { %1154 = vmatprep.subr.bf16.mxu0 %v1344_v12  ;;  %1273 = vmatpush3.bf16.msra.mxu1 %v1347_v18  ;;  %s1024_s22 = sshll.u32 %s1684_s14, 4  ;;  %s1754_s22 = int_to_ptr.vmem [resolvable:$true] %s1024_s22 }
  0x23   : > { %1266 = vmatprep.subr.bf16.mxu1 %v1348_v19  ;;  %s1356_s19 = scalar_lea.vmem %s1754_s22, 4096  ;;  %p1363_p0 = scmp.lt.s32.totalorder %s1754_s22, %s1361_s6 }
  0x24   : > { %1112 = vmatmul.mubr.msk.bf16.gmra.mxu0 %vm334_vm2, %v1325_v15  ;;  %p1357_p11 = scmp.ne.s32.totalorder %s1754_s22, %s1356_s19  ;;  %p1364_p1 = scmp.lt.s32.totalorder %s1362_s7, %s1356_s19 }
  0x25   : > { %445 = vmatprep.mubr.bf16.mxu0 %v1419_v5  ;;  %1155 = vmatpush3.bf16.msra.mxu0 %v1345_v14 }
  0x26   : > { %1156 = vmatprep.subr.bf16.mxu0 %v1346_v17  ;;  %1274 = vmatpush3.bf16.msra.mxu1 %v1349_v20  ;;  %p1358_p12 = pnand %p1357_p11, %p1486_p5  ;;  %p1365_p2 = por %p1364_p1, %p1363_p0 }
  0x27   : > { %1267 = vmatprep.subr.bf16.mxu1 %v1350_v27 }
  0x28   : > { %p1359_p13 = pneg %p1358_p12 }
  0x29   : > { %1157 = vmatpush3.bf16.msra.mxu0 %v1347_v18 }
  0x2a   : > { %1158 = vmatprep.subr.bf16.mxu0 %v1348_v19  ;;  %1275 = vmatpush3.bf16.msra.mxu1 %v1351_v28  ;;  %p1366_p3 = pnand %p1365_p2, %p1359_p13 }
  0x2b   : > { %1268 = vmatprep.subr.bf16.mxu1 %v1352_v30 }
  0x2c   : > { %1113 = vmatmul.mubr.msk.bf16.gmra.mxu0 %vm334_vm2, %v1326_v16 }
  0x2d   : > { %455 = vmatprep.mubr.bf16.mxu0 %v1419_v5  ;;  %1159 = vmatpush3.bf16.msra.mxu0 %v1349_v20 }
  0x2e   : > { %1160 = vmatprep.subr.bf16.mxu0 %v1350_v27  ;;  %1276 = vmatpush3.bf16.msra.mxu1 %v1353_v31 }
  0x2f   : > { %1269 = vmatprep.subr.bf16.mxu1 %v1354_v32 }
  0x31   : > { %1161 = vmatpush3.bf16.msra.mxu0 %v1351_v28 }
  0x32   : > { %1162 = vmatprep.subr.bf16.mxu0 %v1352_v30  ;;  %1277 = vmatpush3.bf16.msra.mxu1 %v1355_v33 }
  0x34   : > { %1114 = vmatmul.mubr.msk.bf16.gmra.mxu0 %vm334_vm2, %v1327_v21 }
  0x35   : > { %465 = vmatprep.mubr.bf16.mxu0 %v1419_v5  ;;  %1163 = vmatpush3.bf16.msra.mxu0 %v1353_v31 }
  0x36   : > { %1164 = vmatprep.subr.bf16.mxu0 %v1354_v32 }
  0x39   : > { %1165 = vmatpush3.bf16.msra.mxu0 %v1355_v33 }
  0x3c   : > { %1115 = vmatmul.mubr.msk.bf16.gmra.mxu0 %vm334_vm2, %v1328_v22 }
  0x3d   : > { %475 = vmatprep.mubr.bf16.mxu0 %v1419_v5 }
  0x44   : > { %1116 = vmatmul.mubr.msk.bf16.gmra.mxu0 %vm334_vm2, %v1329_v23 }
  0x45   : > { %485 = vmatprep.mubr.bf16.mxu0 %v1419_v5 }
  0x4c   : > { %1117 = vmatmul.mubr.msk.bf16.gmra.mxu0 %vm334_vm2, %v1330_v24 }
  0x4d   : > { %495 = vmatprep.mubr.bf16.mxu0 %v1419_v5 }
  0x54   : > { %1118 = vmatmul.mubr.msk.bf16.gmra.mxu0 %vm334_vm2, %v1331_v25 }
  0x55   : > { %505 = vmatprep.mubr.bf16.mxu0 %v1419_v5 }
  0x5c   : > { %1119 = vmatmul.mubr.msk.bf16.gmra.mxu0 %vm334_vm2, %v1332_v26 }
  0x5d   : > { %515 = vmatprep.mubr.bf16.mxu0 %v1419_v5 }
  0x64   : > { %1120 = vmatmul.mubr.msk.bf16.gmra.mxu0 %vm334_vm2, %v1333_v29 }
  0x65   : > { %525 = vmatprep.mubr.bf16.mxu0 %v1419_v5 }
  0x6c   : > { %1121 = vmatmul.mubr.msk.bf16.gmra.mxu0 %vm334_vm2, %v1334_v34 }
  0x6d   : > { %535 = vmatprep.mubr.bf16.mxu0 %v1419_v5 }
  0x74   : > { %1122 = vmatmul.mubr.msk.bf16.gmra.mxu0 %vm334_vm2, %v1335_v35 }
  0x75   : > { %545 = vmatprep.mubr.bf16.mxu0 %v1419_v5 }
  0x7c   : > { %1123 = vmatmul.mubr.msk.bf16.gmra.mxu0 %vm334_vm2, %v1336_v36 }
  0x7d   : > { %555 = vmatprep.mubr.bf16.mxu0 %v1419_v5 }
  0x84   : > { %1124 = vmatmul.mubr.msk.bf16.gmra.mxu0 %vm334_vm2, %v1337_v37 }
  0x85   : > { %565 = vmatprep.mubr.bf16.mxu0 %v1419_v5 }
  0x8c   : > { %1125 = vmatmul.mubr.msk.bf16.gmra.mxu0 %vm334_vm2, %v1338_v38 }
  0x8d   : > { %575 = vmatprep.mubr.bf16.mxu0 %v1419_v5 }
  0x94   : > { %1126 = vmatmul.mubr.msk.bf16.gmra.mxu0 %vm334_vm2, %v1339_v39 }
  0xdc   : > { %v427_v45 = vpop.f32.mrf.mxu0 }
  0xdd   : > { %v428_v52 = vadd.f32 %v427_v45, %v1609_v47 }
  0xde   : > { %v429_v48 = vpop.f32.mrf.mxu0 }
  0xdf   : > { %v430_v50 = vadd.f32 %v429_v48, %v1607_v46  ;;  %v586_v59 = vmax.f32 %v428_v52, 0.0 }
  0xe0   : > { %v431_v49 = vpop.f32.mrf.mxu0 }
  0xe1   : > { %v432_v51 = vadd.f32 %v431_v49, %v1609_v47  ;;  %v587_v57 = vmax.f32 %v430_v50, 0.0 }
  0xe2   : > { %v433_v53 = vpop.f32.mrf.mxu0 }
  0xe3   : > { %v434_v54 = vadd.f32 %v433_v53, %v1607_v46  ;;  %v588_v55 = vmax.f32 %v432_v51, 0.0 }
  0xe4   : > { %v437_v56 = vpop.f32.mrf.mxu0 }
  0xe5   : > { %v589_v58 = vmax.f32 %v434_v54, 0.0  ;;  %v650_v62 = vpack.c.bf16 %v588_v55, %v586_v59  ;;  %v438_v2 = vadd.f32 %v437_v56, %v1609_v47 }
  0xe6   : > { %v439_v60 = vpop.f32.mrf.mxu0 }
  0xe7   : > { %v651_v61 = vpack.c.bf16 %v589_v58, %v587_v57  ;;  %v440_v0 = vadd.f32 %v439_v60, %v1607_v46  ;;  %v590_v9 = vmax.f32 %v438_v2, 0.0 }
  0xe8   : > { %v441_v63 = vpop.f32.mrf.mxu0 }
  0xe9   : > { %v442_v1 = vadd.f32 %v441_v63, %v1609_v47  ;;  %849 = vmatprep.mubr.bf16.mxu0 %v651_v61  ;;  %v591_v7 = vmax.f32 %v440_v0, 0.0 }
  0xea   : > { %v443_v3 = vpop.f32.mrf.mxu0  ;;  %850 = vmatmul.mubr.bf16.vlgmr.msra.gmra.mxu0 %v650_v62 }
  0xeb   : > { %v444_v4 = vadd.f32 %v443_v3, %v1607_v46  ;;  %v592_v5 = vmax.f32 %v442_v1, 0.0 }
  0xec   : > { %v447_v6 = vpop.f32.mrf.mxu0 }
  0xed   : > { %v593_v8 = vmax.f32 %v444_v4, 0.0  ;;  %v652_v12 = vpack.c.bf16 %v592_v5, %v590_v9  ;;  %v448_v16 = vadd.f32 %v447_v6, %v1609_v47 }
  0xee   : > { %v449_v10 = vpop.f32.mrf.mxu0 }
  0xef   : > { %v653_v11 = vpack.c.bf16 %v593_v8, %v591_v7  ;;  %v450_v14 = vadd.f32 %v449_v10, %v1607_v46  ;;  %v594_v23 = vmax.f32 %v448_v16, 0.0 }
  0xf0   : > { %v451_v13 = vpop.f32.mrf.mxu0 }
  0xf1   : > { %v452_v15 = vadd.f32 %v451_v13, %v1609_v47  ;;  %857 = vmatprep.mubr.bf16.mxu1 %v653_v11  ;;  %v595_v21 = vmax.f32 %v450_v14, 0.0 }
  0xf2   : > { %v453_v17 = vpop.f32.mrf.mxu0  ;;  %858 = vmatmul.mubr.bf16.vlgmr.msra.gmra.mxu1 %v652_v12 }
  0xf3   : > { %v454_v18 = vadd.f32 %v453_v17, %v1607_v46  ;;  %v596_v19 = vmax.f32 %v452_v15, 0.0 }
  0xf4   : > { %v457_v20 = vpop.f32.mrf.mxu0 }
  0xf5   : > { %v597_v22 = vmax.f32 %v454_v18, 0.0  ;;  %v654_v26 = vpack.c.bf16 %v596_v19, %v594_v23  ;;  %v458_v30 = vadd.f32 %v457_v20, %v1609_v47 }
  0xf6   : > { %v459_v24 = vpop.f32.mrf.mxu0 }
  0xf7   : > { %v655_v25 = vpack.c.bf16 %v597_v22, %v595_v21  ;;  %v460_v28 = vadd.f32 %v459_v24, %v1607_v46  ;;  %v598_v37 = vmax.f32 %v458_v30, 0.0 }
  0xf8   : > { %v461_v27 = vpop.f32.mrf.mxu0 }
  0xf9   : > { %v462_v29 = vadd.f32 %v461_v27, %v1609_v47  ;;  %865 = vmatprep.mubr.bf16.mxu1 %v655_v25  ;;  %v599_v35 = vmax.f32 %v460_v28, 0.0 }
  0xfa   : > { %v463_v31 = vpop.f32.mrf.mxu0  ;;  %866 = vmatmul.mubr.bf16.gmra.mxu1 %v654_v26 }
  0xfb   : > { %v464_v32 = vadd.f32 %v463_v31, %v1607_v46  ;;  %v600_v33 = vmax.f32 %v462_v29, 0.0 }
  0xfc   : > { %v467_v34 = vpop.f32.mrf.mxu0 }
  0xfd   : > { %v601_v36 = vmax.f32 %v464_v32, 0.0  ;;  %v656_v40 = vpack.c.bf16 %v600_v33, %v598_v37  ;;  %v468_v44 = vadd.f32 %v467_v34, %v1609_v47 }
  0xfe   : > { %v469_v38 = vpop.f32.mrf.mxu0 }
  0xff   : > { %v657_v39 = vpack.c.bf16 %v601_v36, %v599_v35  ;;  %v470_v42 = vadd.f32 %v469_v38, %v1607_v46  ;;  %v602_v53 = vmax.f32 %v468_v44, 0.0 }
 0x100   : > { %v471_v41 = vpop.f32.mrf.mxu0 }
 0x101   : > { %v472_v43 = vadd.f32 %v471_v41, %v1609_v47  ;;  %873 = vmatprep.mubr.bf16.mxu1 %v657_v39  ;;  %v603_v51 = vmax.f32 %v470_v42, 0.0 }
 0x102   : > { %v473_v45 = vpop.f32.mrf.mxu0  ;;  %874 = vmatmul.mubr.bf16.gmra.mxu1 %v656_v40 }
 0x103   : > { %v474_v48 = vadd.f32 %v473_v45, %v1607_v46  ;;  %v604_v49 = vmax.f32 %v472_v43, 0.0 }
 0x104   : > { %v477_v50 = vpop.f32.mrf.mxu0 }
 0x105   : > { %v605_v52 = vmax.f32 %v474_v48, 0.0  ;;  %v658_v56 = vpack.c.bf16 %v604_v49, %v602_v53  ;;  %v478_v60 = vadd.f32 %v477_v50, %v1609_v47 }
 0x106   : > { %v479_v54 = vpop.f32.mrf.mxu0 }
 0x107   : > { %v659_v55 = vpack.c.bf16 %v605_v52, %v603_v51  ;;  %v480_v58 = vadd.f32 %v479_v54, %v1607_v46  ;;  %v606_v3 = vmax.f32 %v478_v60, 0.0 }
 0x108   : > { %v481_v57 = vpop.f32.mrf.mxu0 }
 0x109   : > { %v482_v59 = vadd.f32 %v481_v57, %v1609_v47  ;;  %881 = vmatprep.mubr.bf16.mxu1 %v659_v55  ;;  %v607_v1 = vmax.f32 %v480_v58, 0.0 }
 0x10a   : > { %v483_v61 = vpop.f32.mrf.mxu0  ;;  %882 = vmatmul.mubr.bf16.gmra.mxu1 %v658_v56 }
 0x10b   : > { %v484_v62 = vadd.f32 %v483_v61, %v1607_v46  ;;  %v608_v63 = vmax.f32 %v482_v59, 0.0 }
 0x10c   : > { %v487_v0 = vpop.f32.mrf.mxu0 }
 0x10d   : > { %v609_v2 = vmax.f32 %v484_v62, 0.0  ;;  %v660_v6 = vpack.c.bf16 %v608_v63, %v606_v3  ;;  %v488_v10 = vadd.f32 %v487_v0, %v1609_v47 }
 0x10e   : > { %v489_v4 = vpop.f32.mrf.mxu0 }
 0x10f   : > { %v661_v5 = vpack.c.bf16 %v609_v2, %v607_v1  ;;  %v490_v8 = vadd.f32 %v489_v4, %v1607_v46  ;;  %v610_v17 = vmax.f32 %v488_v10, 0.0 }
 0x110   : > { %v491_v7 = vpop.f32.mrf.mxu0 }
 0x111   : > { %v492_v9 = vadd.f32 %v491_v7, %v1609_v47  ;;  %889 = vmatprep.mubr.bf16.mxu1 %v661_v5  ;;  %v611_v15 = vmax.f32 %v490_v8, 0.0 }
 0x112   : > { %v493_v11 = vpop.f32.mrf.mxu0  ;;  %890 = vmatmul.mubr.bf16.gmra.mxu1 %v660_v6 }
 0x113   : > { %v494_v12 = vadd.f32 %v493_v11, %v1607_v46  ;;  %v612_v13 = vmax.f32 %v492_v9, 0.0 }
 0x114   : > { %v497_v14 = vpop.f32.mrf.mxu0 }
 0x115   : > { %v613_v16 = vmax.f32 %v494_v12, 0.0  ;;  %v662_v20 = vpack.c.bf16 %v612_v13, %v610_v17  ;;  %v498_v24 = vadd.f32 %v497_v14, %v1609_v47 }
 0x116   : > { %v499_v18 = vpop.f32.mrf.mxu0 }
 0x117   : > { %v663_v19 = vpack.c.bf16 %v613_v16, %v611_v15  ;;  %v500_v22 = vadd.f32 %v499_v18, %v1607_v46  ;;  %v614_v31 = vmax.f32 %v498_v24, 0.0 }
 0x118   : > { %v501_v21 = vpop.f32.mrf.mxu0 }
 0x119   : > { %v502_v23 = vadd.f32 %v501_v21, %v1609_v47  ;;  %897 = vmatprep.mubr.bf16.mxu1 %v663_v19  ;;  %v615_v29 = vmax.f32 %v500_v22, 0.0 }
 0x11a   : > { %v503_v25 = vpop.f32.mrf.mxu0  ;;  %898 = vmatmul.mubr.bf16.gmra.mxu1 %v662_v20 }
 0x11b   : > { %v504_v26 = vadd.f32 %v503_v25, %v1607_v46  ;;  %v616_v27 = vmax.f32 %v502_v23, 0.0 }
 0x11c   : > { %v507_v28 = vpop.f32.mrf.mxu0 }
 0x11d   : > { %v617_v30 = vmax.f32 %v504_v26, 0.0  ;;  %v664_v34 = vpack.c.bf16 %v616_v27, %v614_v31  ;;  %v508_v38 = vadd.f32 %v507_v28, %v1609_v47 }
 0x11e   : > { %v509_v32 = vpop.f32.mrf.mxu0 }
 0x11f   : > { %v665_v33 = vpack.c.bf16 %v617_v30, %v615_v29  ;;  %v510_v36 = vadd.f32 %v509_v32, %v1607_v46  ;;  %v618_v45 = vmax.f32 %v508_v38, 0.0 }
 0x120   : > { %v511_v35 = vpop.f32.mrf.mxu0 }
 0x121   : > { %v512_v37 = vadd.f32 %v511_v35, %v1609_v47  ;;  %905 = vmatprep.mubr.bf16.mxu1 %v665_v33  ;;  %v619_v43 = vmax.f32 %v510_v36, 0.0 }
 0x122   : > { %v513_v39 = vpop.f32.mrf.mxu0  ;;  %906 = vmatmul.mubr.bf16.gmra.mxu1 %v664_v34 }
 0x123   : > { %v514_v40 = vadd.f32 %v513_v39, %v1607_v46  ;;  %v620_v41 = vmax.f32 %v512_v37, 0.0 }
 0x124   : > { %v517_v42 = vpop.f32.mrf.mxu0 }
 0x125   : > { %v621_v44 = vmax.f32 %v514_v40, 0.0  ;;  %v666_v50 = vpack.c.bf16 %v620_v41, %v618_v45  ;;  %v518_v54 = vadd.f32 %v517_v42, %v1609_v47 }
 0x126   : > { %v519_v48 = vpop.f32.mrf.mxu0 }
 0x127   : > { %v667_v49 = vpack.c.bf16 %v621_v44, %v619_v43  ;;  %v520_v52 = vadd.f32 %v519_v48, %v1607_v46  ;;  %v622_v61 = vmax.f32 %v518_v54, 0.0 }
 0x128   : > { %v521_v51 = vpop.f32.mrf.mxu0 }
 0x129   : > { %v522_v53 = vadd.f32 %v521_v51, %v1609_v47  ;;  %913 = vmatprep.mubr.bf16.mxu1 %v667_v49  ;;  %v623_v59 = vmax.f32 %v520_v52, 0.0 }
 0x12a   : > { %v523_v55 = vpop.f32.mrf.mxu0  ;;  %914 = vmatmul.mubr.bf16.gmra.mxu1 %v666_v50 }
 0x12b   : > { %v524_v56 = vadd.f32 %v523_v55, %v1607_v46  ;;  %v624_v57 = vmax.f32 %v522_v53, 0.0 }
 0x12c   : > { %v527_v58 = vpop.f32.mrf.mxu0 }
 0x12d   : > { %v625_v60 = vmax.f32 %v524_v56, 0.0  ;;  %v668_v0 = vpack.c.bf16 %v624_v57, %v622_v61  ;;  %v528_v4 = vadd.f32 %v527_v58, %v1609_v47 }
 0x12e   : > { %v529_v62 = vpop.f32.mrf.mxu0 }
 0x12f   : > { %v669_v63 = vpack.c.bf16 %v625_v60, %v623_v59  ;;  %v530_v2 = vadd.f32 %v529_v62, %v1607_v46  ;;  %v626_v11 = vmax.f32 %v528_v4, 0.0 }
 0x130   : > { %v531_v1 = vpop.f32.mrf.mxu0 }
 0x131   : > { %v532_v3 = vadd.f32 %v531_v1, %v1609_v47  ;;  %921 = vmatprep.mubr.bf16.mxu1 %v669_v63  ;;  %v627_v9 = vmax.f32 %v530_v2, 0.0 }
 0x132   : > { %v533_v5 = vpop.f32.mrf.mxu0  ;;  %922 = vmatmul.mubr.bf16.gmra.mxu1 %v668_v0 }
 0x133   : > { %v534_v6 = vadd.f32 %v533_v5, %v1607_v46  ;;  %v628_v7 = vmax.f32 %v532_v3, 0.0 }
 0x134   : > { %v537_v8 = vpop.f32.mrf.mxu0 }
 0x135   : > { %v629_v10 = vmax.f32 %v534_v6, 0.0  ;;  %v670_v14 = vpack.c.bf16 %v628_v7, %v626_v11  ;;  %v538_v18 = vadd.f32 %v537_v8, %v1609_v47 }
 0x136   : > { %v539_v12 = vpop.f32.mrf.mxu0 }
 0x137   : > { %v671_v13 = vpack.c.bf16 %v629_v10, %v627_v9  ;;  %v540_v16 = vadd.f32 %v539_v12, %v1607_v46  ;;  %v630_v25 = vmax.f32 %v538_v18, 0.0 }
 0x138   : > { %v541_v15 = vpop.f32.mrf.mxu0 }
 0x139   : > { %v542_v17 = vadd.f32 %v541_v15, %v1609_v47  ;;  %929 = vmatprep.mubr.bf16.mxu1 %v671_v13  ;;  %v631_v23 = vmax.f32 %v540_v16, 0.0 }
 0x13a   : > { %v543_v19 = vpop.f32.mrf.mxu0  ;;  %930 = vmatmul.mubr.bf16.gmra.mxu1 %v670_v14 }
 0x13b   : > { %v544_v20 = vadd.f32 %v543_v19, %v1607_v46  ;;  %v632_v21 = vmax.f32 %v542_v17, 0.0 }
 0x13c   : > { %v547_v22 = vpop.f32.mrf.mxu0 }
 0x13d   : > { %v633_v24 = vmax.f32 %v544_v20, 0.0  ;;  %v672_v28 = vpack.c.bf16 %v632_v21, %v630_v25  ;;  %v548_v32 = vadd.f32 %v547_v22, %v1609_v47 }
 0x13e   : > { %v549_v26 = vpop.f32.mrf.mxu0 }
 0x13f   : > { %v673_v27 = vpack.c.bf16 %v633_v24, %v631_v23  ;;  %v550_v30 = vadd.f32 %v549_v26, %v1607_v46  ;;  %v634_v39 = vmax.f32 %v548_v32, 0.0 }
 0x140   : > { %v551_v29 = vpop.f32.mrf.mxu0 }
 0x141   : > { %v552_v31 = vadd.f32 %v551_v29, %v1609_v47  ;;  %937 = vmatprep.mubr.bf16.mxu1 %v673_v27  ;;  %v635_v37 = vmax.f32 %v550_v30, 0.0 }
 0x142   : > { %v553_v33 = vpop.f32.mrf.mxu0  ;;  %938 = vmatmul.mubr.bf16.gmra.mxu1 %v672_v28 }
 0x143   : > { %v554_v34 = vadd.f32 %v553_v33, %v1607_v46  ;;  %v636_v35 = vmax.f32 %v552_v31, 0.0 }
 0x144   : > { %v557_v36 = vpop.f32.mrf.mxu0 }
 0x145   : > { %v637_v38 = vmax.f32 %v554_v34, 0.0  ;;  %v674_v42 = vpack.c.bf16 %v636_v35, %v634_v39  ;;  %v558_v48 = vadd.f32 %v557_v36, %v1609_v47 }
 0x146   : > { %v559_v40 = vpop.f32.mrf.mxu0 }
 0x147   : > { %v675_v41 = vpack.c.bf16 %v637_v38, %v635_v37  ;;  %v560_v44 = vadd.f32 %v559_v40, %v1607_v46  ;;  %v638_v55 = vmax.f32 %v558_v48, 0.0 }
 0x148   : > { %v561_v43 = vpop.f32.mrf.mxu0 }
 0x149   : > { %v562_v45 = vadd.f32 %v561_v43, %v1609_v47  ;;  %945 = vmatprep.mubr.bf16.mxu1 %v675_v41  ;;  %v639_v53 = vmax.f32 %v560_v44, 0.0 }
 0x14a   : > { %v563_v49 = vpop.f32.mrf.mxu0  ;;  %946 = vmatmul.mubr.bf16.gmra.mxu1 %v674_v42 }
 0x14b   : > { %v564_v50 = vadd.f32 %v563_v49, %v1607_v46  ;;  %v640_v51 = vmax.f32 %v562_v45, 0.0 }
 0x14c   : > { %v567_v52 = vpop.f32.mrf.mxu0 }
 0x14d   : > { %v641_v54 = vmax.f32 %v564_v50, 0.0  ;;  %v676_v58 = vpack.c.bf16 %v640_v51, %v638_v55  ;;  %v568_v62 = vadd.f32 %v567_v52, %v1609_v47 }
 0x14e   : > { %v569_v56 = vpop.f32.mrf.mxu0 }
 0x14f   : > { %v677_v57 = vpack.c.bf16 %v641_v54, %v639_v53  ;;  %v570_v60 = vadd.f32 %v569_v56, %v1607_v46  ;;  %v642_v5 = vmax.f32 %v568_v62, 0.0 }
 0x150   : > { %v571_v59 = vpop.f32.mrf.mxu0 }
 0x151   : > { %v572_v61 = vadd.f32 %v571_v59, %v1609_v47  ;;  %953 = vmatprep.mubr.bf16.mxu1 %v677_v57  ;;  %v643_v3 = vmax.f32 %v570_v60, 0.0 }
 0x152   : > { %v573_v63 = vpop.f32.mrf.mxu0  ;;  %954 = vmatmul.mubr.bf16.gmra.mxu1 %v676_v58 }
 0x153   : > { %v574_v0 = vadd.f32 %v573_v63, %v1607_v46  ;;  %v644_v1 = vmax.f32 %v572_v61, 0.0 }
 0x154   : > { %v577_v2 = vpop.f32.mrf.mxu0 }
 0x155   : > { %v645_v4 = vmax.f32 %v574_v0, 0.0  ;;  %v678_v8 = vpack.c.bf16 %v644_v1, %v642_v5  ;;  %v578_v12 = vadd.f32 %v577_v2, %v1609_v47 }
 0x156   : > { %v579_v6 = vpop.f32.mrf.mxu0 }
 0x157   : > { %v679_v7 = vpack.c.bf16 %v645_v4, %v643_v3  ;;  %v580_v10 = vadd.f32 %v579_v6, %v1607_v46  ;;  %v646_v18 = vmax.f32 %v578_v12, 0.0 }
 0x158   : > { %v581_v9 = vpop.f32.mrf.mxu0 }
 0x159   : > { %v582_v11 = vadd.f32 %v581_v9, %v1609_v47  ;;  %961 = vmatprep.mubr.bf16.mxu1 %v679_v7  ;;  %v647_v16 = vmax.f32 %v580_v10, 0.0  ;;  %v1681_v47 = vld [vmem:[%s1803_s3 + $0x2] ss:$0 sm:$0xff] }
 0x15a   : > { %v583_v13 = vpop.f32.mrf.mxu0  ;;  %962 = vmatmul.mubr.bf16.gmra.mxu1 %v678_v8 }
 0x15b   : > { %v584_v14 = vadd.f32 %v583_v13, %v1607_v46  ;;  %v648_v15 = vmax.f32 %v582_v11, 0.0 }
 0x15d   : > { %v649_v17 = vmax.f32 %v584_v14, 0.0  ;;  %v680_v20 = vpack.c.bf16 %v648_v15, %v646_v18 }
 0x15f   : > { %v681_v19 = vpack.c.bf16 %v649_v17, %v647_v16 }
 0x161   : > { %969 = vmatprep.mubr.bf16.mxu1 %v681_v19 }
 0x162   : > { %970 = vmatmul.mubr.bf16.gmra.mxu1 %v680_v20 }
 0x1aa   : > { %v1166_v21 = vpop.f32.mrf.mxu0 }
 0x1ac   : > { %v1167_v22 = vpop.f32.mrf.mxu0 }
 0x1ad   : > { %v1168_v23 = vadd.f32 %v1167_v22, %v1166_v21 }
 0x1ae   : > { %v1169_v46 = vpop.f32.mrf.mxu0 }
 0x1af   : > { %v852_v24 = vadd.f32 %v1168_v23, %v1681_v47 }
 0x1b0   : > { %v1170_v25 = vpop.f32.mrf.mxu0 }
 0x1b1   : > { %978 = vst [vmem:[%s1684_s14] sm:$0xff] %v852_v24  ;;  %v1171_v26 = vadd.f32 %v1170_v25, %v1169_v46 }
 0x1b2   : > { %v1172_v27 = vpop.f32.mrf.mxu1 }
 0x1b3   : > { %v855_v28 = vadd.f32 %v1171_v26, %v1681_v47 }
 0x1b4   : > { %v1173_v29 = vpop.f32.mrf.mxu1 }
 0x1b5   : > { %979 = vst [vmem:[%s1684_s14 + $0x8] sm:$0xff] %v855_v28  ;;  %v1174_v30 = vadd.f32 %v1173_v29, %v1172_v27 }
 0x1b6   : > { %v1175_v31 = vpop.f32.mrf.mxu1 }
 0x1b7   : > { %v860_v32 = vadd.f32 %v1174_v30, %v1681_v47 }
 0x1b8   : > { %v1176_v33 = vpop.f32.mrf.mxu1 }
 0x1b9   : > { %980 = vst [vmem:[%s1684_s14 + $0x10] sm:$0xff] %v860_v32  ;;  %v1177_v34 = vadd.f32 %v1176_v33, %v1175_v31 }
 0x1ba   : > { %v1178_v35 = vpop.f32.mrf.mxu1 }
 0x1bb   : > { %v863_v36 = vadd.f32 %v1177_v34, %v1681_v47 }
 0x1bc   : > { %v1179_v37 = vpop.f32.mrf.mxu1 }
 0x1bd   : > { %981 = vst [vmem:[%s1684_s14 + $0x18] sm:$0xff] %v863_v36  ;;  %v1180_v38 = vadd.f32 %v1179_v37, %v1178_v35 }
 0x1be   : > { %v1181_v39 = vpop.f32.mrf.mxu1 }
 0x1bf   : > { %v868_v40 = vadd.f32 %v1180_v38, %v1681_v47 }
 0x1c0   : > { %v1182_v41 = vpop.f32.mrf.mxu1 }
 0x1c1   : > { %982 = vst [vmem:[%s1684_s14 + $0x20] sm:$0xff] %v868_v40  ;;  %v1183_v42 = vadd.f32 %v1182_v41, %v1181_v39 }
 0x1c2   : > { %v1184_v43 = vpop.f32.mrf.mxu1 }
 0x1c3   : > { %v871_v44 = vadd.f32 %v1183_v42, %v1681_v47 }
 0x1c4   : > { %v1185_v45 = vpop.f32.mrf.mxu1 }
 0x1c5   : > { %983 = vst [vmem:[%s1684_s14 + $0x28] sm:$0xff] %v871_v44  ;;  %v1186_v48 = vadd.f32 %v1185_v45, %v1184_v43 }
 0x1c6   : > { %v1187_v49 = vpop.f32.mrf.mxu1 }
 0x1c7   : > { %v876_v50 = vadd.f32 %v1186_v48, %v1681_v47 }
 0x1c8   : > { %v1188_v51 = vpop.f32.mrf.mxu1 }
 0x1c9   : > { %984 = vst [vmem:[%s1684_s14 + $0x30] sm:$0xff] %v876_v50  ;;  %v1189_v52 = vadd.f32 %v1188_v51, %v1187_v49 }
 0x1ca   : > { %v1190_v53 = vpop.f32.mrf.mxu1 }
 0x1cb   : > { %v879_v54 = vadd.f32 %v1189_v52, %v1681_v47 }
 0x1cc   : > { %v1191_v55 = vpop.f32.mrf.mxu1 }
 0x1cd   : > { %985 = vst [vmem:[%s1684_s14 + $0x38] sm:$0xff] %v879_v54  ;;  %v1192_v56 = vadd.f32 %v1191_v55, %v1190_v53 }
 0x1ce   : > { %v1193_v57 = vpop.f32.mrf.mxu1 }
 0x1cf   : > { %v884_v58 = vadd.f32 %v1192_v56, %v1681_v47 }
 0x1d0   : > { %v1194_v59 = vpop.f32.mrf.mxu1 }
 0x1d1   : > { %986 = vst [vmem:[%s1684_s14 + $0x40] sm:$0xff] %v884_v58  ;;  %v1195_v60 = vadd.f32 %v1194_v59, %v1193_v57 }
 0x1d2   : > { %v1196_v61 = vpop.f32.mrf.mxu1 }
 0x1d3   : > { %v887_v62 = vadd.f32 %v1195_v60, %v1681_v47 }
 0x1d4   : > { %v1197_v63 = vpop.f32.mrf.mxu1 }
 0x1d5   : > { %987 = vst [vmem:[%s1684_s14 + $0x48] sm:$0xff] %v887_v62  ;;  %v1198_v0 = vadd.f32 %v1197_v63, %v1196_v61 }
 0x1d6   : > { %v1199_v1 = vpop.f32.mrf.mxu1 }
 0x1d7   : > { %v892_v2 = vadd.f32 %v1198_v0, %v1681_v47 }
 0x1d8   : > { %v1200_v3 = vpop.f32.mrf.mxu1 }
 0x1d9   : > { %988 = vst [vmem:[%s1684_s14 + $0x50] sm:$0xff] %v892_v2  ;;  %v1201_v4 = vadd.f32 %v1200_v3, %v1199_v1 }
 0x1da   : > { %v1202_v5 = vpop.f32.mrf.mxu1 }
 0x1db   : > { %v895_v6 = vadd.f32 %v1201_v4, %v1681_v47 }
 0x1dc   : > { %v1203_v7 = vpop.f32.mrf.mxu1 }
 0x1dd   : > { %989 = vst [vmem:[%s1684_s14 + $0x58] sm:$0xff] %v895_v6  ;;  %v1204_v8 = vadd.f32 %v1203_v7, %v1202_v5 }
 0x1de   : > { %v1205_v9 = vpop.f32.mrf.mxu1 }
 0x1df   : > { %v900_v10 = vadd.f32 %v1204_v8, %v1681_v47 }
 0x1e0   : > { %v1206_v11 = vpop.f32.mrf.mxu1 }
 0x1e1   : > { %990 = vst [vmem:[%s1684_s14 + $0x60] sm:$0xff] %v900_v10  ;;  %v1207_v12 = vadd.f32 %v1206_v11, %v1205_v9 }
 0x1e2   : > { %v1208_v13 = vpop.f32.mrf.mxu1 }
 0x1e3   : > { %v903_v14 = vadd.f32 %v1207_v12, %v1681_v47 }
 0x1e4   : > { %v1209_v15 = vpop.f32.mrf.mxu1 }
 0x1e5   : > { %991 = vst [vmem:[%s1684_s14 + $0x68] sm:$0xff] %v903_v14  ;;  %v1210_v16 = vadd.f32 %v1209_v15, %v1208_v13 }
 0x1e6   : > { %v1211_v17 = vpop.f32.mrf.mxu1 }
 0x1e7   : > { %v908_v18 = vadd.f32 %v1210_v16, %v1681_v47 }
 0x1e8   : > { %v1212_v19 = vpop.f32.mrf.mxu1 }
 0x1e9   : > { %992 = vst [vmem:[%s1684_s14 + $0x70] sm:$0xff] %v908_v18  ;;  %v1213_v20 = vadd.f32 %v1212_v19, %v1211_v17 }
 0x1ea   : > { %v1214_v21 = vpop.f32.mrf.mxu1 }
 0x1eb   : > { %v911_v22 = vadd.f32 %v1213_v20, %v1681_v47 }
 0x1ec   : > { %v1215_v23 = vpop.f32.mrf.mxu1 }
 0x1ed   : > { %993 = vst [vmem:[%s1684_s14 + $0x78] sm:$0xff] %v911_v22  ;;  %v1216_v46 = vadd.f32 %v1215_v23, %v1214_v21 }
 0x1ee   : > { %v1217_v24 = vpop.f32.mrf.mxu1 }
 0x1ef   : > { %v916_v25 = vadd.f32 %v1216_v46, %v1681_v47 }
 0x1f0   : > { %v1218_v26 = vpop.f32.mrf.mxu1 }
 0x1f1   : > { %994 = vst [vmem:[%s1684_s14 + $0x80] sm:$0xff] %v916_v25  ;;  %v1219_v27 = vadd.f32 %v1218_v26, %v1217_v24 }
 0x1f2   : > { %v1220_v28 = vpop.f32.mrf.mxu1 }
 0x1f3   : > { %v919_v29 = vadd.f32 %v1219_v27, %v1681_v47 }
 0x1f4   : > { %v1221_v30 = vpop.f32.mrf.mxu1 }
 0x1f5   : > { %995 = vst [vmem:[%s1684_s14 + $0x88] sm:$0xff] %v919_v29  ;;  %v1222_v31 = vadd.f32 %v1221_v30, %v1220_v28 }
 0x1f6   : > { %v1223_v32 = vpop.f32.mrf.mxu1 }
 0x1f7   : > { %v924_v33 = vadd.f32 %v1222_v31, %v1681_v47 }
 0x1f8   : > { %v1224_v34 = vpop.f32.mrf.mxu1 }
 0x1f9   : > { %996 = vst [vmem:[%s1684_s14 + $0x90] sm:$0xff] %v924_v33  ;;  %v1225_v35 = vadd.f32 %v1224_v34, %v1223_v32 }
 0x1fa   : > { %v1226_v36 = vpop.f32.mrf.mxu1 }
 0x1fb   : > { %v927_v37 = vadd.f32 %v1225_v35, %v1681_v47 }
 0x1fc   : > { %v1227_v38 = vpop.f32.mrf.mxu1 }
 0x1fd   : > { %997 = vst [vmem:[%s1684_s14 + $0x98] sm:$0xff] %v927_v37  ;;  %v1228_v39 = vadd.f32 %v1227_v38, %v1226_v36 }
 0x1fe   : > { %v1229_v40 = vpop.f32.mrf.mxu1 }
 0x1ff   : > { %v932_v41 = vadd.f32 %v1228_v39, %v1681_v47 }
 0x200   : > { %v1230_v42 = vpop.f32.mrf.mxu1 }
 0x201   : > { %998 = vst [vmem:[%s1684_s14 + $0xa0] sm:$0xff] %v932_v41  ;;  %v1231_v43 = vadd.f32 %v1230_v42, %v1229_v40 }
 0x202   : > { %v1232_v44 = vpop.f32.mrf.mxu1 }
 0x203   : > { %v935_v45 = vadd.f32 %v1231_v43, %v1681_v47 }
 0x204   : > { %v1233_v48 = vpop.f32.mrf.mxu1 }
 0x205   : > { %999 = vst [vmem:[%s1684_s14 + $0xa8] sm:$0xff] %v935_v45  ;;  %v1234_v49 = vadd.f32 %v1233_v48, %v1232_v44 }
 0x206   : > { %v1235_v50 = vpop.f32.mrf.mxu1 }
 0x207   : > { %v940_v51 = vadd.f32 %v1234_v49, %v1681_v47 }
 0x208   : > { %v1236_v52 = vpop.f32.mrf.mxu1 }
 0x209   : > { %1000 = vst [vmem:[%s1684_s14 + $0xb0] sm:$0xff] %v940_v51  ;;  %v1237_v53 = vadd.f32 %v1236_v52, %v1235_v50 }
 0x20a   : > { %v1238_v54 = vpop.f32.mrf.mxu1 }
 0x20b   : > { %v943_v55 = vadd.f32 %v1237_v53, %v1681_v47 }
 0x20c   : > { %v1239_v56 = vpop.f32.mrf.mxu1 }
 0x20d   : > { %1001 = vst [vmem:[%s1684_s14 + $0xb8] sm:$0xff] %v943_v55  ;;  %v1240_v57 = vadd.f32 %v1239_v56, %v1238_v54 }
 0x20e   : > { %v1241_v58 = vpop.f32.mrf.mxu1 }
 0x20f   : > { %v948_v59 = vadd.f32 %v1240_v57, %v1681_v47 }
 0x210   : > { %v1242_v60 = vpop.f32.mrf.mxu1 }
 0x211   : > { %1002 = vst [vmem:[%s1684_s14 + $0xc0] sm:$0xff] %v948_v59  ;;  %v1243_v61 = vadd.f32 %v1242_v60, %v1241_v58 }
 0x212   : > { %v1244_v62 = vpop.f32.mrf.mxu1 }
 0x213   : > { %v951_v63 = vadd.f32 %v1243_v61, %v1681_v47 }
 0x214   : > { %v1245_v0 = vpop.f32.mrf.mxu1 }
 0x215   : > { %1003 = vst [vmem:[%s1684_s14 + $0xc8] sm:$0xff] %v951_v63  ;;  %v1246_v1 = vadd.f32 %v1245_v0, %v1244_v62 }
 0x216   : > { %v1247_v2 = vpop.f32.mrf.mxu1 }
 0x217   : > { %v956_v3 = vadd.f32 %v1246_v1, %v1681_v47 }
 0x218   : > { %v1248_v4 = vpop.f32.mrf.mxu1 }
 0x219   : > { %1004 = vst [vmem:[%s1684_s14 + $0xd0] sm:$0xff] %v956_v3  ;;  %v1249_v5 = vadd.f32 %v1248_v4, %v1247_v2 }
 0x21a   : > { %v1250_v6 = vpop.f32.mrf.mxu1 }
 0x21b   : > { %v959_v7 = vadd.f32 %v1249_v5, %v1681_v47 }
 0x21c   : > { %v1251_v8 = vpop.f32.mrf.mxu1 }
 0x21d   : > { %1005 = vst [vmem:[%s1684_s14 + $0xd8] sm:$0xff] %v959_v7  ;;  %v1252_v9 = vadd.f32 %v1251_v8, %v1250_v6 }
 0x21e   : > { %v1253_v10 = vpop.f32.mrf.mxu1 }
 0x21f   : > { %v964_v11 = vadd.f32 %v1252_v9, %v1681_v47 }
 0x220   : > { %v1254_v12 = vpop.f32.mrf.mxu1 }
 0x221   : > { %1006 = vst [vmem:[%s1684_s14 + $0xe0] sm:$0xff] %v964_v11  ;;  %v1255_v13 = vadd.f32 %v1254_v12, %v1253_v10 }
 0x222   : > { %v1256_v14 = vpop.f32.mrf.mxu1 }
 0x223   : > { %v967_v15 = vadd.f32 %v1255_v13, %v1681_v47 }
 0x224   : > { %v1257_v16 = vpop.f32.mrf.mxu1 }
 0x225   : > { %1007 = vst [vmem:[%s1684_s14 + $0xe8] sm:$0xff] %v967_v15  ;;  %v1258_v17 = vadd.f32 %v1257_v16, %v1256_v14 }
 0x226   : > { %v1259_v18 = vpop.f32.mrf.mxu1 }
 0x227   : > { %v972_v19 = vadd.f32 %v1258_v17, %v1681_v47 }
 0x228   : > { %v1260_v20 = vpop.f32.mrf.mxu1 }
 0x229   : > { %1008 = vst [vmem:[%s1684_s14 + $0xf0] sm:$0xff] %v972_v19  ;;  %v1261_v21 = vadd.f32 %v1260_v20, %v1259_v18 }
 0x22b   : > { %v975_v22 = vadd.f32 %v1261_v21, %v1681_v47 }
 0x22d   : > { %1009 = vst [vmem:[%s1684_s14 + $0xf8] sm:$0xff] %v975_v22 }
 0x22e   : > { %1369 = shalt.err (!%p1366_p3)
}
 0x22f   : > { %s1370_s8 = scalar_lea.hbm %s1752_s29, 4096  ;;  %s1374_s23 = scalar_lea.hbm %s1804_s4, 8192 }
 0x230   : > { %p1371_p4 = scmp.ne.s32.totalorder %s1752_s29, %s1370_s8  ;;  %p1375_p9 = scmp.lt.s32.totalorder %s1752_s29, %s1804_s4 }
 0x231   : > { %p1376_p10 = scmp.lt.s32.totalorder %s1374_s23, %s1370_s8 }
 0x232   : > { %p1372_p7 = pnand %p1371_p4, %p1486_p5 }
 0x233   : > { %p1377_p11 = por %p1376_p10, %p1375_p9 }
 0x234   : > { %p1373_p8 = pneg %p1372_p7 }
 0x236   : > { %p1378_p12 = pnand %p1377_p11, %p1373_p8 }
 0x238   : > { %1381 = shalt.err (!%p1378_p12)
}
 0x239   : > { %s1421_s13 = smov 128   ;;  %s1422_s14 = smov 8  }
 0x23a   : > { %1278 = dma.vmem_to_hbm [thread:$0]  (%p1486_p5), %s1754_s22, 4096, %s1752_s29, %s1760_s30, %s1421_s13, %s1421_s13, %s1422_s14  }
 0x23b PF: > { %p1284_p13 = scmp.ge.s32.totalorder %s1416_s18, 2  ;;  %s1039_s20 = sand.u32 1, %s1404_s15  }
 0x23c   : > { %s1040_s27 = scalar_lea.sflag [#allocation3], %s1039_s20 }
 0x23d   : > { %p1281_p0 = pnand %p1284_p13, %p1490_p6 }
 0x23f   : > { %p1282_p1 = pneg %p1281_p0 }
 0x241   : > { %1399 = dma.done.wait (%p1282_p1), %s1040_s27, 4096  }
 0x242   : > { %1401 = vsyncadd (%p1282_p1), %s1040_s27, 4294963200  ;;  %p14_p2 = scmp.ge.s32.totalorder %s1473_s21, 4   ;;  %s1807_s15 = smov %s1408_s16 }
 0x243   : > { %s1808_s16 = smov %s1412_s17  ;;  %s1809_s17 = smov %s1484_s24 }
 0x244   : > { %s1810_s18 = smov %s1473_s21  ;;  %16 = sbr.rel (!%p14_p2) target bundleno = 3 (0x3), region = 71 }
 0x249   :  { %1045 = vsyncpa [#allocation3], 1 }
 0x24a   :  { %1047 = vsyncpa [#allocation3 + $0x1], 1 }

</bundles_post_ra>
